<compile_context>
chip_gen: v5e
topology: v5e:2x2
jax: 0.10.0
libtpu: 0.0.40
codegen_flags: <defaults>
</compile_context>

<pallas_src>
import functools

import jax
import jax.numpy as jnp
from jax.experimental import pallas as pl
from jax.experimental.pallas import tpu as pltpu

LANE = 128
SUBLANE = 8


def _round_up(x, m):
    return ((x + m - 1) // m) * m


# ----------------------------------------------------------------------------------------------
# Kernel: fused dual-MLP (delta + reward networks) on one packed activation block.
#   x_ref : (tb, in_w)   [ feature | acs_onehot | 0 ]
#   w1    : (in_w, hid_w)  columns [0:H) = delta net, [H:2H) = reward net
#   w2    : (hid_w, out_w) columns [0:fs) = delta out, column fs = reward out
#   out   : (tb, fs_p + out_w) = [ next_obs (fs_p) | delta/reward block (out_w) ]
# ----------------------------------------------------------------------------------------------
def _dyn_model_kernel(x_ref, w1_ref, b1_ref, w2_ref, b2_ref, out_ref, *, fs_p):
    x = x_ref[...]                                                     # (tb, in_w)

    # Fused first layer of both networks -> one MXU pass.  f32 accumulate.
    h = jnp.tanh(
        jnp.dot(x, w1_ref[...], preferred_element_type=jnp.float32) + b1_ref[...]
    )                                                                  # (tb, hid_w) f32
    h = h.astype(w2_ref.dtype)                                         # no-op in f32 mode

    # Fused second layer: [delta | reward | 0] in one MXU pass.
    y = jnp.dot(h, w2_ref[...], preferred_element_type=jnp.float32) + b2_ref[...]  # (tb, out_w)

    # Lane-dense output slab: [ next_obs | delta/reward ].  Padding lanes of the next_obs block
    # may contain (acs + reward) garbage; the wrapper only slices the first fs lanes.
    out_ref[:, fs_p:] = y.astype(out_ref.dtype)
    out_ref[:, :fs_p] = (x[:, :fs_p].astype(jnp.float32) + y[:, :fs_p]).astype(out_ref.dtype)


# ----------------------------------------------------------------------------------------------
# One-time parameter packing (hoisted out of the forward path; call once per parameter update).
# ----------------------------------------------------------------------------------------------
def pack_dynamic_model_params(params, feature_size, act_dim, *, compute_dtype=jnp.float32):
    """params: w1d (fs+act_dim,H), b1d (H,), w2d (H,fs), b2d (fs,), w1r, b1r, w2r (H,1), b2r (1,)."""
    fs, ad = feature_size, act_dim
    H = params["w1d"].shape[1]
    f32 = jnp.float32

    in_w = _round_up(fs + ad, LANE)          # packed [feat | acs | 0] width
    hid_w = _round_up(2 * H, LANE)           # both hidden layers, contiguous
    out_w = _round_up(fs + 1, LANE)          # [delta | reward | 0] width

    w1 = (jnp.zeros((in_w, hid_w), f32)
          .at[:fs + ad, :H].set(params["w1d"].astype(f32))
          .at[:fs + ad, H:2 * H].set(params["w1r"].astype(f32)))
    b1 = (jnp.zeros((1, hid_w), f32)
          .at[:, :H].set(params["b1d"].astype(f32).reshape(1, -1))
          .at[:, H:2 * H].set(params["b1r"].astype(f32).reshape(1, -1)))
    w2 = (jnp.zeros((hid_w, out_w), f32)
          .at[:H, :fs].set(params["w2d"].astype(f32))
          .at[H:2 * H, fs:fs + 1].set(params["w2r"].astype(f32)))
    b2 = (jnp.zeros((1, out_w), f32)
          .at[:, :fs].set(params["b2d"].astype(f32).reshape(1, -1))
          .at[:, fs:fs + 1].set(params["b2r"].astype(f32).reshape(1, -1)))

    cdt = jnp.dtype(compute_dtype)
    return dict(
        w1=w1.astype(cdt), w2=w2.astype(cdt),   # MXU operands (bf16 on v6e/v7x if requested)
        b1=b1, b2=b2,                           # biases stay f32 (added to f32 accumulators)
        fs=fs, act_dim=ad, hidden=H, compute_dtype=cdt,
    )


# ----------------------------------------------------------------------------------------------
# Forward wrapper.
# ----------------------------------------------------------------------------------------------
def dynamic_model_forward(feature_vec, acs_onehot, packed, *, tb=None):
    """feature_vec: (B, fs), acs_onehot: (B, act_dim).  Returns
    (next_obs_pred, next_reward_pred, reward_pred, delta_pred)."""
    fs, ad = packed["fs"], packed["act_dim"]
    assert feature_vec.shape[1] == fs and acs_onehot.shape[1] == ad
    B = feature_vec.shape[0]
    cdt = packed["compute_dtype"]

    in_w = packed["w1"].shape[0]
    out_w = packed["w2"].shape[1]
    fs_p = _round_up(fs, LANE)
    slab_w = fs_p + out_w

    # Only sublane-align the batch; no padding up to tb (ragged last grid tile is allowed:
    # rows never mix, OOB output rows are dropped and extra rows are sliced off below).
    B_p = _round_up(max(B, SUBLANE), SUBLANE)

    # Pack [feature | acs_onehot | 0] into one lane-aligned block (single MXU operand; padded
    # K lanes are explicitly zero so they cannot contaminate the matmul).
    x = (jnp.zeros((B_p, in_w), cdt)
         .at[:B, :fs].set(feature_vec.astype(cdt))
         .at[:B, fs:fs + ad].set(acs_onehot.astype(cdt)))

    # Batch tile: multiple of 8, VMEM-bounded (double-buffered in+out under ~8 MiB), and at
    # least 2 grid steps for larger batches so v7x megacore can shard the "parallel" axis.
    if tb is None:
        row_bytes = 2 * (in_w + slab_w) * cdt.itemsize
        cap = max(SUBLANE, min(2048, ((8 << 20) // row_bytes) // SUBLANE * SUBLANE))
        tb = min(cap, _round_up(max(pl.cdiv(B_p, 2), SUBLANE), SUBLANE))
    grid = (pl.cdiv(B_p, tb),)

    row_spec = lambda n: pl.BlockSpec((tb, n), lambda i: (i, 0))
    full_spec = lambda a: pl.BlockSpec(a.shape, lambda i: (0, 0))

    slab = pl.pallas_call(
        functools.partial(_dyn_model_kernel, fs_p=fs_p),
        out_shape=jax.ShapeDtypeStruct((B_p, slab_w), cdt),
        grid=grid,
        in_specs=[row_spec(in_w),
                  full_spec(packed["w1"]), full_spec(packed["b1"]),
                  full_spec(packed["w2"]), full_spec(packed["b2"])],
        out_specs=row_spec(slab_w),
        compiler_params=pltpu.CompilerParams(
            dimension_semantics=("parallel",),
            vmem_limit_bytes=32 * 1024 * 1024),
    )(x, packed["w1"], packed["b1"], packed["w2"], packed["b2"])

    next_obs = slab[:B, :fs]
    delta = slab[:B, fs_p:fs_p + fs]
    reward = slab[:B, fs_p + fs:fs_p + fs + 1]
    next_reward = reward   # torch's next_reward_pred is reward_pred copied to host (same values)
    return next_obs, next_reward, reward, delta


# ----------------------------------------------------------------------------------------------
# Demo / correctness check
# ----------------------------------------------------------------------------------------------
def _init_linear(key, fan_in, fan_out):
    """Deterministic init (shape-compatible with nn.Linear; stored as (in, out))."""
    kw, kb = jax.random.split(key)
    bound = 1.0 / jnp.sqrt(fan_in)
    w = jax.random.uniform(kw, (fan_in, fan_out), jnp.float32, -bound, bound)
    b = jax.random.uniform(kb, (1, fan_out), jnp.float32, -bound, bound)
    return w, b


def _reference(feature_vec, acs_onehot, p):
    x = jnp.concatenate([feature_vec, acs_onehot], axis=1)
    delta = jnp.tanh(x @ p["w1d"] + p["b1d"]) @ p["w2d"] + p["b2d"]
    reward = jnp.tanh(x @ p["w1r"] + p["b1r"]) @ p["w2r"] + p["b2r"]
    return feature_vec + delta, reward, delta


if __name__ == "__main__":
    batch, obs_dim, feature_size, act_dim, hidden = 6, 16, 32, 4, 32

    key = jax.random.PRNGKey(0)
    k_obs, k_act, k_enc, k1d, k2d, k1r, k2r, k_obs2, k_act2 = jax.random.split(key, 9)

    # --- inputs (cont=False -> discrete actions, one-hot) ---
    obs_normalized = jax.random.normal(k_obs, (batch, obs_dim), jnp.float32)
    actions = jax.random.randint(k_act, (batch,), 0, act_dim)
    acs_onehot = jax.nn.one_hot(actions, act_dim, dtype=jnp.float32)

    # --- external encoder (argument of forward; plain-JAX glue, outside the module spec) ---
    we, be = _init_linear(k_enc, obs_dim, feature_size)
    feature_vec = jnp.tanh(obs_normalized @ we + be)                   # (B, feature_size)

    # --- Dynamic_Model parameters (delta_network + reward_network MLPs) ---
    w1d, b1d = _init_linear(k1d, feature_size + act_dim, hidden)
    w2d, b2d = _init_linear(k2d, hidden, feature_size)
    w1r, b1r = _init_linear(k1r, feature_size + act_dim, hidden)
    w2r, b2r = _init_linear(k2r, hidden, 1)
    params = dict(w1d=w1d, b1d=b1d, w2d=w2d, b2d=b2d,
                  w1r=w1r, b1r=b1r, w2r=w2r, b2r=b2r)

    # Pack once (hoisted out of the per-call path).
    packed_f32 = pack_dynamic_model_params(params, feature_size, act_dim,
                                           compute_dtype=jnp.float32)

    # --- f32 path: exact parity with the torch/f32 reference ---
    next_obs, next_reward, reward, delta = jax.block_until_ready(
        dynamic_model_forward(feature_vec, acs_onehot, packed_f32))
    next_obs_ref, reward_ref, delta_ref = _reference(feature_vec, acs_onehot, params)

    assert next_obs.shape == (batch, feature_size)
    assert delta.shape == (batch, feature_size)
    assert reward.shape == (batch, 1)
    assert jnp.allclose(delta, delta_ref, atol=1e-5)
    assert jnp.allclose(reward, reward_ref, atol=1e-5)
    assert jnp.allclose(next_obs, next_obs_ref, atol=1e-5)
    assert jnp.allclose(next_reward, reward_ref, atol=1e-5)

    # --- larger batch: multi-step "parallel" grid + ragged last tile (no batch padding) ---
    big_B = 200
    obs2 = jax.random.normal(k_obs2, (big_B, obs_dim), jnp.float32)
    acts2 = jax.random.randint(k_act2, (big_B,), 0, act_dim)
    acs2 = jax.nn.one_hot(acts2, act_dim, dtype=jnp.float32)
    feat2 = jnp.tanh(obs2 @ we + be)
    no2, nr2, r2, d2 = jax.block_until_ready(
        dynamic_model_forward(feat2, acs2, packed_f32))
    no2_ref, r2_ref, d2_ref = _reference(feat2, acs2, params)
    assert jnp.allclose(d2, d2_ref, atol=1e-5)
    assert jnp.allclose(r2, r2_ref, atol=1e-5)
    assert jnp.allclose(no2, no2_ref, atol=1e-5)

    # --- bf16 operand path (v6e/v7x fast path): f32 accumulate, looser tolerance ---
    packed_bf16 = pack_dynamic_model_params(params, feature_size, act_dim,
                                            compute_dtype=jnp.bfloat16)
    no_b, nr_b, r_b, d_b = jax.block_until_ready(
        dynamic_model_forward(feature_vec, acs_onehot, packed_bf16))
    assert jnp.allclose(d_b.astype(jnp.float32), delta_ref, atol=3e-2)
    assert jnp.allclose(r_b.astype(jnp.float32), reward_ref, atol=3e-2)
    assert jnp.allclose(no_b.astype(jnp.float32), next_obs_ref, atol=3e-2)

    print("KERNEL_OK")
</pallas_src>

<mosaic_0001>
module attributes {stable_mosaic.version = 11 : i64} {
  func.func @_dyn_model_kernel(%arg0: i32, %arg1: memref<8x128xf32, #tpu.memory_space<vmem>>, %arg2: memref<128x128xf32, #tpu.memory_space<vmem>>, %arg3: memref<1x128xf32, #tpu.memory_space<vmem>>, %arg4: memref<128x128xf32, #tpu.memory_space<vmem>>, %arg5: memref<1x128xf32, #tpu.memory_space<vmem>>, %arg6: memref<8x256xf32, #tpu.memory_space<vmem>>) attributes {dimension_semantics = [#tpu.dimension_semantics<parallel>], iteration_bounds = array<i64: 1>, scalar_prefetch = 0 : i64, scratch_operands = 0 : i64, tpu.core_type = #tpu.core_type<tc>, window_params = [{transform_indices = @transform_0, window_bounds = array<i64: 8, 128>}, {pipeline_mode = #tpu.pipeline_mode<synchronous>, transform_indices = @transform_1, window_bounds = array<i64: 128, 128>}, {pipeline_mode = #tpu.pipeline_mode<synchronous>, transform_indices = @transform_2, window_bounds = array<i64: 1, 128>}, {pipeline_mode = #tpu.pipeline_mode<synchronous>, transform_indices = @transform_3, window_bounds = array<i64: 128, 128>}, {pipeline_mode = #tpu.pipeline_mode<synchronous>, transform_indices = @transform_4, window_bounds = array<i64: 1, 128>}, {transform_indices = @transform_5, window_bounds = array<i64: 8, 256>}]} {
    %c0 = arith.constant 0 : index
    %c0_0 = arith.constant 0 : index
    %0 = vector.load %arg1[%c0, %c0_0] : memref<8x128xf32, #tpu.memory_space<vmem>>, vector<8x128xf32>
    %c0_1 = arith.constant 0 : index
    %c0_2 = arith.constant 0 : index
    %1 = vector.load %arg2[%c0_1, %c0_2] : memref<128x128xf32, #tpu.memory_space<vmem>>, vector<128x128xf32>
    %cst = arith.constant dense<0.000000e+00> : vector<8x128xf32>
    %2 = tpu.matmul %0, %1, %cst {dimension_numbers = #tpu.dot_dimension_numbers<[1], [0], [0], [1], [0, 0, 1, 1], [], []>} : vector<8x128xf32>, vector<128x128xf32>, vector<8x128xf32> -> vector<8x128xf32>
    %c0_3 = arith.constant 0 : index
    %c0_4 = arith.constant 0 : index
    %3 = vector.load %arg3[%c0_3, %c0_4] : memref<1x128xf32, #tpu.memory_space<vmem>>, vector<1x128xf32>
    %4 = vector.broadcast %3 : vector<1x128xf32> to vector<8x128xf32>
    %5 = arith.addf %2, %4 : vector<8x128xf32>
    %6 = math.tanh %5 : vector<8x128xf32>
    %c0_5 = arith.constant 0 : index
    %c0_6 = arith.constant 0 : index
    %7 = vector.load %arg4[%c0_5, %c0_6] : memref<128x128xf32, #tpu.memory_space<vmem>>, vector<128x128xf32>
    %cst_7 = arith.constant dense<0.000000e+00> : vector<8x128xf32>
    %8 = tpu.matmul %6, %7, %cst_7 {dimension_numbers = #tpu.dot_dimension_numbers<[1], [0], [0], [1], [0, 0, 1, 1], [], []>} : vector<8x128xf32>, vector<128x128xf32>, vector<8x128xf32> -> vector<8x128xf32>
    %c0_8 = arith.constant 0 : index
    %c0_9 = arith.constant 0 : index
    %9 = vector.load %arg5[%c0_8, %c0_9] : memref<1x128xf32, #tpu.memory_space<vmem>>, vector<1x128xf32>
    %10 = vector.broadcast %9 : vector<1x128xf32> to vector<8x128xf32>
    %11 = arith.addf %8, %10 : vector<8x128xf32>
    %c0_10 = arith.constant 0 : index
    %c128 = arith.constant 128 : index
    %12 = vector.load %arg6[%c0_10, %c128] : memref<8x256xf32, #tpu.memory_space<vmem>>, vector<8x128xf32>
    tpu.vector_store %arg6[%c0_10, %c128], %11 {strides = array<i32>} : memref<8x256xf32, #tpu.memory_space<vmem>>, vector<8x128xf32>,
    %13 = arith.addf %0, %11 : vector<8x128xf32>
    %c0_11 = arith.constant 0 : index
    %c0_12 = arith.constant 0 : index
    %14 = vector.load %arg6[%c0_11, %c0_12] : memref<8x256xf32, #tpu.memory_space<vmem>>, vector<8x128xf32>
    tpu.vector_store %arg6[%c0_11, %c0_12], %13 {strides = array<i32>} : memref<8x256xf32, #tpu.memory_space<vmem>>, vector<8x128xf32>,
    return
  }
  func.func @transform_0(%arg0: i32) -> (i32, i32) {
    %c0_i32 = arith.constant 0 : i32
    %c0_i32_0 = arith.constant 0 : i32
    return %arg0, %c0_i32 : i32, i32
  }
  func.func @transform_1(%arg0: i32) -> (i32, i32) {
    %c0_i32 = arith.constant 0 : i32
    %c0_i32_0 = arith.constant 0 : i32
    %c0_i32_1 = arith.constant 0 : i32
    return %c0_i32, %c0_i32_0 : i32, i32
  }
  func.func @transform_2(%arg0: i32) -> (i32, i32) {
    %c0_i32 = arith.constant 0 : i32
    %c0_i32_0 = arith.constant 0 : i32
    %c0_i32_1 = arith.constant 0 : i32
    return %c0_i32, %c0_i32_0 : i32, i32
  }
  func.func @transform_3(%arg0: i32) -> (i32, i32) {
    %c0_i32 = arith.constant 0 : i32
    %c0_i32_0 = arith.constant 0 : i32
    %c0_i32_1 = arith.constant 0 : i32
    return %c0_i32, %c0_i32_0 : i32, i32
  }
  func.func @transform_4(%arg0: i32) -> (i32, i32) {
    %c0_i32 = arith.constant 0 : i32
    %c0_i32_0 = arith.constant 0 : i32
    %c0_i32_1 = arith.constant 0 : i32
    return %c0_i32, %c0_i32_0 : i32, i32
  }
  func.func @transform_5(%arg0: i32) -> (i32, i32) {
    %c0_i32 = arith.constant 0 : i32
    %c0_i32_0 = arith.constant 0 : i32
    return %arg0, %c0_i32 : i32, i32
  }
}

</mosaic_0001>

<bundles_post_ra>
// kernel: tpu_custom_call.1
= control target key start
LH: loop header
LB: loop body
LE: loop exit
PB: predicated region body
PF: predicated region fallthrough
CT: control target
= control target key end

     0   :  { %10 = vsyncpa [#allocation3], 0  ;;  %s335_s0 = inlined_call_operand.hbm [shape: f32[8,128], index: 0, kind: input, shape index: {}]   ;;  %s336_s1 = inlined_call_operand.hbm [shape: f32[128,128], index: 1, kind: input, shape index: {}]   ;;  %s337_s2 = inlined_call_operand.vmem [shape: f32[1,128], index: 2, kind: input, shape index: {}]   ;;  %s338_s3 = inlined_call_operand.hbm [shape: f32[128,128], index: 3, kind: input, shape index: {}]   ;;  %s339_s4 = inlined_call_operand.vmem [shape: f32[1,128], index: 4, kind: input, shape index: {}]   ;;  %s340_s5 = inlined_call_operand.hbm [shape: f32[8,256], index: 5, kind: output, shape index: {}]  }
   0x1   :  { %11 = vsyncpa [#allocation6], 0  ;;  %s28_s20 = sshll.u32 %s336_s1, 4  ;;  %s29_s20 = int_to_ptr.hbm [resolvable:$true] %s28_s20 }
   0x2   :  { %12 = vsyncpa [#allocation4], 0  ;;  %s281_s21 = smov [#allocation5]   ;;  %s18_s25 = sshll.u32 %s335_s0, 4  ;;  %s19_s25 = int_to_ptr.hbm [resolvable:$true] %s18_s25 }
   0x3   :  { %s30_s22 = sshll.u32 %s281_s21, 4  ;;  %s282_s26 = smov 128   ;;  %s31_s22 = int_to_ptr.vmem [resolvable:$true] %s30_s22 }
   0x4   :  { %s283_s27 = smov 8   ;;  %s284_s28 = smov [#allocation2]  }
   0x5   :  { %36 = dma.hbm_to_vmem [thread:$0]  %s29_s20, 2048, %s31_s22, [#allocation6], %s282_s26, %s282_s26, %s283_s27  }
   0x6   :  { %s20_s29 = sshll.u32 %s284_s28, 4  ;;  %s43_s7 = sshll.u32 %s338_s3, 4  ;;  %s21_s29 = int_to_ptr.vmem [resolvable:$true] %s20_s29  ;;  %s44_s7 = int_to_ptr.hbm [resolvable:$true] %s43_s7 }
   0x7   :  { %23 = dma.hbm_to_vmem [thread:$0]  %s19_s25, 128, %s21_s29, [#allocation3]  }
   0x8   :  { %s285_s1 = smov [#allocation7]  }
   0x9   :  { %s45_s8 = sshll.u32 %s285_s1, 4  ;;  %s46_s8 = int_to_ptr.vmem [resolvable:$true] %s45_s8 }
   0xa   :  { %51 = dma.hbm_to_vmem [thread:$0]  %s44_s7, 2048, %s46_s8, [#allocation6], %s282_s26, %s282_s26, %s283_s27  }
   0xb   :  { %275 = dma.done.wait [#allocation3], 128  }
   0xc   :  { %276 = vsyncadd [#allocation3], 4294967168 }
   0xd   :  { %277 = dma.done.wait [#allocation6], 4096  }
   0xe   :  { %278 = vsyncadd [#allocation6], 4294963200  ;;  %v82_v0 = vld [vmem:[#allocation5 + $0x78] sm:$0xff]  ;;  %v81_v1 = vld [vmem:[#allocation5 + $0x70] sm:$0xff]  ;;  %s286_s11 = smov [#allocation8]   ;;  %s158_s15 = sshll.u32 %s340_s5, 4  ;;  %s159_s15 = int_to_ptr.hbm [resolvable:$true] %s158_s15 }
   0xf   :  { %87 = vmatpush.msra.mxu0 %v82_v0  ;;  %v80_v2 = vld [vmem:[#allocation5 + $0x68] sm:$0xff]  ;;  %v79_v3 = vld [vmem:[#allocation5 + $0x60] sm:$0xff]  ;;  %v123_v4 = vld [vmem:[#allocation7 + $0x78] sm:$0xff]  ;;  %s156_s12 = sshll.u32 %s286_s11, 4  ;;  %s157_s12 = int_to_ptr.vmem [resolvable:$true] %s156_s12 }
  0x10   :  { %v78_v5 = vld [vmem:[#allocation5 + $0x58] sm:$0xff]  ;;  %128 = vmatpush.msra.mxu1 %v123_v4  ;;  %v122_v6 = vld [vmem:[#allocation7 + $0x70] sm:$0xff]  ;;  %v121_v7 = vld [vmem:[#allocation7 + $0x68] sm:$0xff] }
  0x11   :  { %88 = vmatpush.msra.mxu0 %v81_v1  ;;  %v77_v8 = vld [vmem:[#allocation5 + $0x50] sm:$0xff]  ;;  %v120_v9 = vld [vmem:[#allocation7 + $0x60] sm:$0xff]  ;;  %v76_v10 = vld [vmem:[#allocation5 + $0x48] sm:$0xff] }
  0x12   :  { %129 = vmatpush.msra.mxu1 %v122_v6  ;;  %v119_v11 = vld [vmem:[#allocation7 + $0x58] sm:$0xff]  ;;  %v75_v12 = vld [vmem:[#allocation5 + $0x40] sm:$0xff]  ;;  %v118_v13 = vld [vmem:[#allocation7 + $0x50] sm:$0xff] }
  0x13   :  { %89 = vmatpush.msra.mxu0 %v80_v2  ;;  %v74_v14 = vld [vmem:[#allocation5 + $0x38] sm:$0xff]  ;;  %v117_v15 = vld [vmem:[#allocation7 + $0x48] sm:$0xff]  ;;  %v73_v16 = vld [vmem:[#allocation5 + $0x30] sm:$0xff] }
  0x14   :  { %130 = vmatpush.msra.mxu1 %v121_v7  ;;  %v116_v17 = vld [vmem:[#allocation7 + $0x40] sm:$0xff]  ;;  %v72_v18 = vld [vmem:[#allocation5 + $0x28] sm:$0xff]  ;;  %v115_v19 = vld [vmem:[#allocation7 + $0x38] sm:$0xff] }
  0x15   :  { %90 = vmatpush.msra.mxu0 %v79_v3  ;;  %v71_v20 = vld [vmem:[#allocation5 + $0x20] sm:$0xff]  ;;  %v114_v21 = vld [vmem:[#allocation7 + $0x30] sm:$0xff]  ;;  %v70_v22 = vld [vmem:[#allocation5 + $0x18] sm:$0xff] }
  0x16   :  { %131 = vmatpush.msra.mxu1 %v120_v9  ;;  %v113_v23 = vld [vmem:[#allocation7 + $0x28] sm:$0xff]  ;;  %v69_v24 = vld [vmem:[#allocation5 + $0x10] sm:$0xff]  ;;  %v67_v26 = vld [vmem:[#allocation5] sm:$0xff] }
  0x17   :  { %91 = vmatpush.msra.mxu0 %v78_v5  ;;  %v68_v25 = vld [vmem:[#allocation5 + $0x8] sm:$0xff]  ;;  %v66_v27 = vld [vmem:[#allocation2] sm:$0xff]  ;;  %v112_v28 = vld [vmem:[#allocation7 + $0x20] sm:$0xff] }
  0x18   :  { %132 = vmatpush.msra.mxu1 %v119_v11  ;;  %v111_v29 = vld [vmem:[#allocation7 + $0x18] sm:$0xff]  ;;  %v110_v30 = vld [vmem:[#allocation7 + $0x10] sm:$0xff]  ;;  %v109_v31 = vld [vmem:[#allocation7 + $0x8] sm:$0xff] }
  0x19   :  { %92 = vmatpush.msra.mxu0 %v77_v8  ;;  %v108_v32 = vld [vmem:[#allocation7] sm:$0xff]  ;;  %v175_v33 = vld [vmem:[%s337_s2] ss:$0 sm:$0xff] }
  0x1a   :  { %133 = vmatpush.msra.mxu1 %v118_v13  ;;  %v176_v37 = vld [vmem:[%s339_s4] ss:$0 sm:$0xff] }
  0x1b   :  { %93 = vmatpush.msra.mxu0 %v76_v10 }
  0x1c   :  { %134 = vmatpush.msra.mxu1 %v117_v15 }
  0x1d   :  { %94 = vmatpush.msra.mxu0 %v75_v12 }
  0x1e   :  { %135 = vmatpush.msra.mxu1 %v116_v17 }
  0x1f   :  { %95 = vmatpush.msra.mxu0 %v74_v14 }
  0x20   :  { %136 = vmatpush.msra.mxu1 %v115_v19 }
  0x21   :  { %96 = vmatpush.msra.mxu0 %v73_v16 }
  0x22   :  { %137 = vmatpush.msra.mxu1 %v114_v21 }
  0x23   :  { %97 = vmatpush.msra.mxu0 %v72_v18 }
  0x24   :  { %138 = vmatpush.msra.mxu1 %v113_v23 }
  0x25   :  { %98 = vmatpush.msra.mxu0 %v71_v20 }
  0x26   :  { %139 = vmatpush.msra.mxu1 %v112_v28 }
  0x27   :  { %99 = vmatpush.msra.mxu0 %v70_v22 }
  0x28   :  { %140 = vmatpush.msra.mxu1 %v111_v29 }
  0x29   :  { %100 = vmatpush.msra.mxu0 %v69_v24 }
  0x2a   :  { %141 = vmatpush.msra.mxu1 %v110_v30 }
  0x2b   :  { %101 = vmatpush.msra.mxu0 %v68_v25 }
  0x2c   :  { %142 = vmatpush.msra.mxu1 %v109_v31 }
  0x2d   :  { %102 = vmatpush.msra.mxu0 %v67_v26 }
  0x2e   :  { %103 = vmatmul.f32.vlgmr.msra.gmra.mxu0 %v66_v27  ;;  %143 = vmatpush.msra.mxu1 %v108_v32 }
  0xab   :  { %v104_v34 = vpop.f32.mrf.mxu0 }
  0xac   :  { %v105_v35 = vadd.f32 %v175_v33, %v104_v34 }
  0xae   :  { %177 = vtanh.f32 %v105_v35 }
  0xb4   :  { %v178_v36 = vpop.eup %177 }
  0xb5   :  { %144 = vmatmul.f32.vlgmr.msra.gmra.mxu1 %v178_v36 }
 0x132   :  { %v145_v38 = vpop.f32.mrf.mxu1 }
 0x133   :  { %v146_v39 = vadd.f32 %v176_v37, %v145_v38 }
 0x135   :  { %148 = vst [vmem:[#allocation8 + $0x8] sm:$0xff] %v146_v39  ;;  %v149_v40 = vadd.f32 %v146_v39, %v66_v27 }
 0x137   :  { %150 = vst [vmem:[#allocation8] sm:$0xff] %v149_v40 }
 0x138   :  { %161 = dma.vmem_to_hbm [thread:$0]  %s157_s12, 256, %s159_s15, [#allocation4]  }
 0x139   :  { %279 = dma.done.wait [#allocation4], 256  }
 0x13a   :  { %280 = vsyncadd [#allocation4], 4294967040 }
 0x13b   :  { %166 = vsyncpa [#allocation3], 1 }
 0x13c   :  { %167 = vsyncpa [#allocation6], 1 }
 0x13d   :  { %168 = vsyncpa [#allocation4], 1 }

</bundles_post_ra>
